<compile_context>
chip_gen: v7x
topology: tpu7x:2x2x1
jax: 0.10.0
libtpu: 0.0.40
codegen_flags: <defaults>
</compile_context>

<pallas_src>
import jax
import jax.numpy as jnp
from jax.experimental import pallas as pl
from jax.experimental.pallas import tpu as pltpu


def _round_up(x, m):
    return (x + m - 1) // m * m


def _choose_k_tiling(d_in, max_tk=2048):
    """Pad K to a multiple of 128 and pick the largest dividing tile <= max_tk."""
    k_pad = _round_up(d_in, 128)
    cap = min(max_tk, k_pad)
    cap -= cap % 128
    tk = 128
    t = cap
    while t >= 128:
        if k_pad % t == 0:
            tk = t
            break
        t -= 128
    return k_pad, tk


def _default_tm(n):
    """M tile: big enough to amortize the w6 re-stream, small enough to keep
    >= 2 M tiles (v7x megacore) and stay inside a ~48 MiB scoped VMEM budget."""
    n16 = _round_up(max(n, 1), 16)
    if n16 <= 128:
        return n16                      # tiny ROI batches: no wasted rows
    half = _round_up(n16, 256) // 2     # aim for >= 2 tiles, 256-aligned fills
    return max(128, min(512, half))


def prepare_params(w6, b6, w7, b7):
    """One-time parameter prep (hoisted out of the forward hot path).

    w6: (R, D_in), b6: (R,), w7: (R, R), b7: (R,)  -- PyTorch Linear layout.
    Returns (w6_t bf16 (K_pad, R), b6 f32 (1, R), w7_t bf16 (R, R), b7 f32 (1, R)).
    """
    rep, d_in = w6.shape
    k_pad, _ = _choose_k_tiling(d_in)
    w6_t = jnp.transpose(w6).astype(jnp.bfloat16)           # (D_in, R)
    if k_pad != d_in:
        w6_t = jnp.pad(w6_t, ((0, k_pad - d_in), (0, 0)))   # zero rows: no-op in dot
    w7_t = jnp.transpose(w7).astype(jnp.bfloat16)            # (R, R)
    b6_2d = b6.reshape(1, rep).astype(jnp.float32)
    b7_2d = b7.reshape(1, rep).astype(jnp.float32)
    return w6_t, b6_2d, w7_t, b7_2d


def _two_mlp_head_kernel(x_ref, w6_ref, b6_ref, w7_ref, b7_ref, o_ref):
    # Grid: (m_tile, k_tile); k is the fc6 reduction axis (innermost, "arbitrary").
    # The f32 output block is resident across k (block index (i, 0)), so it
    # doubles as the fc6 accumulator -- no scratch needed.
    k = pl.program_id(1)

    @pl.when(k == 0)
    def _():
        o_ref[...] = jnp.zeros_like(o_ref)

    # Cast the f32 x tile to bf16 on the VPU (hidden under the MXU/DMA stream),
    # then bf16 x bf16 on the MXU with f32 accumulation.
    x_bf = x_ref[...].astype(jnp.bfloat16)
    o_ref[...] += jnp.dot(x_bf, w6_ref[...], preferred_element_type=jnp.float32)

    @pl.when(k == pl.num_programs(1) - 1)
    def _():
        # Finalize in place: bias + ReLU on the f32 accumulator, fc7 + bias + ReLU.
        h = jnp.maximum(o_ref[...] + b6_ref[...], 0.0)
        y = jnp.dot(
            h.astype(w7_ref.dtype), w7_ref[...], preferred_element_type=jnp.float32
        ) + b7_ref[...]
        o_ref[...] = jnp.maximum(y, 0.0)


def _build_in_specs(tm, tk, rep, single_buffer_invariants):
    # b6 / w7 / b7 have constant index maps -> resident; a second pipeline
    # buffer buys nothing, so request single buffering when supported.
    resident_kw = {}
    if single_buffer_invariants:
        resident_kw = dict(pipeline_mode=pl.Buffered(1))
    return [
        pl.BlockSpec((tm, tk), lambda i, k: (i, k)),                  # x: f32 M x K tiles
        pl.BlockSpec((tk, rep), lambda i, k: (k, 0)),                 # w6: bf16 K tiles
        pl.BlockSpec((1, rep), lambda i, k: (0, 0), **resident_kw),   # b6
        pl.BlockSpec((rep, rep), lambda i, k: (0, 0), **resident_kw),  # w7
        pl.BlockSpec((1, rep), lambda i, k: (0, 0), **resident_kw),   # b7
    ]


def two_mlp_head_forward(x_nchw, params, *, tm=None):
    """x_nchw: (N, C, H, W) float32. params: output of prepare_params()."""
    w6_t, b6_2d, w7_t, b7_2d = params
    n = x_nchw.shape[0]
    x_flat = x_nchw.reshape(n, -1).astype(jnp.float32)       # row-major flatten (== torch)
    d_in = x_flat.shape[1]
    k_pad, tk = _choose_k_tiling(d_in)
    assert w6_t.shape[0] == k_pad, "prepare_params() padding must match the K tiling"
    rep = w6_t.shape[1]

    if tm is None:
        tm = _default_tm(n)
    n_pad = _round_up(n, tm)

    # Only pad when actually required (no-op for aligned production shapes).
    if n_pad != n or k_pad != d_in:
        x_flat = jnp.pad(x_flat, ((0, n_pad - n), (0, k_pad - d_in)))

    grid = (n_pad // tm, k_pad // tk)
    m_tiles = grid[0]

    flops = 2 * n_pad * k_pad * rep + 2 * n_pad * rep * rep
    bytes_accessed = (
        x_flat.size * 4                       # x streamed once, f32
        + w6_t.size * 2 * m_tiles             # w6 re-streamed once per M tile
        + w7_t.size * 2
        + b6_2d.size * 4 + b7_2d.size * 4
        + n_pad * rep * 4                     # output writeback
    )

    compiler_params = pltpu.CompilerParams(
        dimension_semantics=("parallel", "arbitrary"),
        # > v5e's 16 MiB default scoped VMEM, < v7x's 64 MiB physical per TC.
        vmem_limit_bytes=48 * 1024 * 1024,
    )
    cost = pl.CostEstimate(
        flops=flops, transcendentals=0, bytes_accessed=bytes_accessed
    )

    out = None
    last_err = None
    for single_buf in (True, False):
        try:
            out = pl.pallas_call(
                _two_mlp_head_kernel,
                out_shape=jax.ShapeDtypeStruct((n_pad, rep), jnp.float32),
                grid=grid,
                in_specs=_build_in_specs(tm, tk, rep, single_buf),
                out_specs=pl.BlockSpec((tm, rep), lambda i, k: (i, 0)),
                compiler_params=compiler_params,
                cost_estimate=cost,
            )(x_flat, w6_t, b6_2d, w7_t, b7_2d)
            break
        except Exception as e:  # fallback: default double-buffered invariants
            last_err = e
            out = None
    if out is None:
        raise last_err

    return out[:n]


def two_mlp_head(x_nchw, w6, b6, w7, b7):
    """Convenience wrapper. In a real model call prepare_params() once at
    parameter-load time and reuse it across forwards."""
    params = prepare_params(w6, b6, w7, b7)
    return two_mlp_head_forward(x_nchw, params)


def _ref_two_mlp_head(x_nchw, w6, b6, w7, b7):
    x = x_nchw.reshape(x_nchw.shape[0], -1)
    h = jnp.maximum(x @ w6.T + b6, 0.0)
    return jnp.maximum(h @ w7.T + b7, 0.0)


if __name__ == "__main__":
    # Small shapes consistent with the module: pooled ROI features.
    N, C, H, W = 8, 4, 16, 16            # in_channels = C*H*W = 1024
    REP = 128                            # representation_size

    key = jax.random.PRNGKey(0)
    kx, k6w, k6b, k7w, k7b = jax.random.split(key, 5)

    x = jax.random.normal(kx, (N, C, H, W), dtype=jnp.float32)
    d_in = C * H * W
    # Deterministic synthetic init (roughly Kaiming-uniform scale like nn.Linear).
    w6 = jax.random.uniform(k6w, (REP, d_in), minval=-1.0, maxval=1.0) / jnp.sqrt(d_in)
    b6 = jax.random.uniform(k6b, (REP,), minval=-1.0, maxval=1.0) / jnp.sqrt(d_in)
    w7 = jax.random.uniform(k7w, (REP, REP), minval=-1.0, maxval=1.0) / jnp.sqrt(REP)
    b7 = jax.random.uniform(k7b, (REP,), minval=-1.0, maxval=1.0) / jnp.sqrt(REP)

    # Hoisted, one-time param prep (transpose + bf16 cast + K padding).
    params = prepare_params(w6, b6, w7, b7)

    out = two_mlp_head_forward(x, params)
    out = jax.block_until_ready(out)

    ref = _ref_two_mlp_head(x, w6, b6, w7, b7)
    assert out.shape == (N, REP), out.shape
    # bf16 operands with f32 accumulation -> loosen tolerance vs the f32 reference.
    assert jnp.allclose(out, ref, atol=2e-2, rtol=2e-2), "mismatch vs reference"

    print("KERNEL_OK")
</pallas_src>

<mosaic_0001>
module attributes {stable_mosaic.version = 11 : i64} {
  func.func @_two_mlp_head_kernel(%arg0: i32, %arg1: i32, %arg2: memref<16x1024xf32, #tpu.memory_space<vmem>>, %arg3: memref<1024x128xbf16, #tpu.memory_space<vmem>>, %arg4: memref<1x128xf32, #tpu.memory_space<vmem>>, %arg5: memref<128x128xbf16, #tpu.memory_space<vmem>>, %arg6: memref<1x128xf32, #tpu.memory_space<vmem>>, %arg7: memref<16x128xf32, #tpu.memory_space<vmem>>) attributes {dimension_semantics = [#tpu.dimension_semantics<parallel>, #tpu.dimension_semantics<arbitrary>], iteration_bounds = array<i64: 1, 1>, scalar_prefetch = 0 : i64, scratch_operands = 0 : i64, tpu.core_type = #tpu.core_type<tc>, window_params = [{transform_indices = @transform_0, window_bounds = array<i64: 16, 1024>}, {transform_indices = @transform_1, window_bounds = array<i64: 1024, 128>}, {pipeline_mode = #tpu.pipeline_mode<synchronous>, transform_indices = @transform_2, window_bounds = array<i64: 1, 128>}, {pipeline_mode = #tpu.pipeline_mode<synchronous>, transform_indices = @transform_3, window_bounds = array<i64: 128, 128>}, {pipeline_mode = #tpu.pipeline_mode<synchronous>, transform_indices = @transform_4, window_bounds = array<i64: 1, 128>}, {transform_indices = @transform_5, window_bounds = array<i64: 16, 128>}]} {
    %c0_i32 = arith.constant 0 : i32
    %0 = arith.cmpi eq, %arg1, %c0_i32 : i32
    %1 = arith.extui %0 : i1 to i32
    %c0_i32_0 = arith.constant 0 : i32
    %2 = arith.cmpi ne, %1, %c0_i32_0 : i32
    scf.if %2 {
      %cst_10 = arith.constant 0.000000e+00 : f32
      %13 = vector.broadcast %cst_10 : f32 to vector<16x128xf32>
      %c0_11 = arith.constant 0 : index
      %c0_12 = arith.constant 0 : index
      %14 = vector.load %arg7[%c0_11, %c0_12] : memref<16x128xf32, #tpu.memory_space<vmem>>, vector<16x128xf32>
      tpu.vector_store %arg7[%c0_11, %c0_12], %13 {strides = array<i32>} : memref<16x128xf32, #tpu.memory_space<vmem>>, vector<16x128xf32>,
    } else {
    }
    %c0 = arith.constant 0 : index
    %c0_1 = arith.constant 0 : index
    %3 = vector.load %arg2[%c0, %c0_1] : memref<16x1024xf32, #tpu.memory_space<vmem>>, vector<16x1024xf32>
    %4 = arith.truncf %3 : vector<16x1024xf32> to vector<16x1024xbf16>
    %c0_2 = arith.constant 0 : index
    %c0_3 = arith.constant 0 : index
    %5 = vector.load %arg7[%c0_2, %c0_3] : memref<16x128xf32, #tpu.memory_space<vmem>>, vector<16x128xf32>
    %c0_4 = arith.constant 0 : index
    %c0_5 = arith.constant 0 : index
    %6 = vector.load %arg3[%c0_4, %c0_5] : memref<1024x128xbf16, #tpu.memory_space<vmem>>, vector<1024x128xbf16>
    %cst = arith.constant dense<0.000000e+00> : vector<16x128xf32>
    %7 = tpu.matmul %4, %6, %cst {dimension_numbers = #tpu.dot_dimension_numbers<[1], [0], [0], [1], [0, 0, 1, 1], [], []>} : vector<16x1024xbf16>, vector<1024x128xbf16>, vector<16x128xf32> -> vector<16x128xf32>
    %8 = arith.addf %5, %7 : vector<16x128xf32>
    %c0_6 = arith.constant 0 : index
    %c0_7 = arith.constant 0 : index
    %9 = vector.load %arg7[%c0_6, %c0_7] : memref<16x128xf32, #tpu.memory_space<vmem>>, vector<16x128xf32>
    tpu.vector_store %arg7[%c0_6, %c0_7], %8 {strides = array<i32>} : memref<16x128xf32, #tpu.memory_space<vmem>>, vector<16x128xf32>,
    %c0_i32_8 = arith.constant 0 : i32
    %10 = arith.cmpi eq, %arg1, %c0_i32_8 : i32
    %11 = arith.extui %10 : i1 to i32
    %c0_i32_9 = arith.constant 0 : i32
    %12 = arith.cmpi ne, %11, %c0_i32_9 : i32
    scf.if %12 {
      %c0_10 = arith.constant 0 : index
      %c0_11 = arith.constant 0 : index
      %13 = vector.load %arg7[%c0_10, %c0_11] : memref<16x128xf32, #tpu.memory_space<vmem>>, vector<16x128xf32>
      %c0_12 = arith.constant 0 : index
      %c0_13 = arith.constant 0 : index
      %14 = vector.load %arg4[%c0_12, %c0_13] : memref<1x128xf32, #tpu.memory_space<vmem>>, vector<1x128xf32>
      %15 = vector.broadcast %14 : vector<1x128xf32> to vector<16x128xf32>
      %16 = arith.addf %13, %15 : vector<16x128xf32>
      %cst_14 = arith.constant 0.000000e+00 : f32
      %17 = vector.broadcast %cst_14 : f32 to vector<16x128xf32>
      %18 = arith.maximumf %16, %17 : vector<16x128xf32>
      %19 = arith.truncf %18 : vector<16x128xf32> to vector<16x128xbf16>
      %c0_15 = arith.constant 0 : index
      %c0_16 = arith.constant 0 : index
      %20 = vector.load %arg5[%c0_15, %c0_16] : memref<128x128xbf16, #tpu.memory_space<vmem>>, vector<128x128xbf16>
      %cst_17 = arith.constant dense<0.000000e+00> : vector<16x128xf32>
      %21 = tpu.matmul %19, %20, %cst_17 {dimension_numbers = #tpu.dot_dimension_numbers<[1], [0], [0], [1], [0, 0, 1, 1], [], []>} : vector<16x128xbf16>, vector<128x128xbf16>, vector<16x128xf32> -> vector<16x128xf32>
      %c0_18 = arith.constant 0 : index
      %c0_19 = arith.constant 0 : index
      %22 = vector.load %arg6[%c0_18, %c0_19] : memref<1x128xf32, #tpu.memory_space<vmem>>, vector<1x128xf32>
      %23 = vector.broadcast %22 : vector<1x128xf32> to vector<16x128xf32>
      %24 = arith.addf %21, %23 : vector<16x128xf32>
      %cst_20 = arith.constant 0.000000e+00 : f32
      %25 = vector.broadcast %cst_20 : f32 to vector<16x128xf32>
      %26 = arith.maximumf %24, %25 : vector<16x128xf32>
      %c0_21 = arith.constant 0 : index
      %c0_22 = arith.constant 0 : index
      %27 = vector.load %arg7[%c0_21, %c0_22] : memref<16x128xf32, #tpu.memory_space<vmem>>, vector<16x128xf32>
      tpu.vector_store %arg7[%c0_21, %c0_22], %26 {strides = array<i32>} : memref<16x128xf32, #tpu.memory_space<vmem>>, vector<16x128xf32>,
    } else {
    }
    return
  }
  func.func @transform_0(%arg0: i32, %arg1: i32) -> (i32, i32) {
    %c0_i32 = arith.constant 0 : i32
    return %arg0, %arg1 : i32, i32
  }
  func.func @transform_1(%arg0: i32, %arg1: i32) -> (i32, i32) {
    %c0_i32 = arith.constant 0 : i32
    %c0_i32_0 = arith.constant 0 : i32
    return %arg1, %c0_i32 : i32, i32
  }
  func.func @transform_2(%arg0: i32, %arg1: i32) -> (i32, i32) {
    %c0_i32 = arith.constant 0 : i32
    %c0_i32_0 = arith.constant 0 : i32
    %c0_i32_1 = arith.constant 0 : i32
    return %c0_i32, %c0_i32_0 : i32, i32
  }
  func.func @transform_3(%arg0: i32, %arg1: i32) -> (i32, i32) {
    %c0_i32 = arith.constant 0 : i32
    %c0_i32_0 = arith.constant 0 : i32
    %c0_i32_1 = arith.constant 0 : i32
    return %c0_i32, %c0_i32_0 : i32, i32
  }
  func.func @transform_4(%arg0: i32, %arg1: i32) -> (i32, i32) {
    %c0_i32 = arith.constant 0 : i32
    %c0_i32_0 = arith.constant 0 : i32
    %c0_i32_1 = arith.constant 0 : i32
    return %c0_i32, %c0_i32_0 : i32, i32
  }
  func.func @transform_5(%arg0: i32, %arg1: i32) -> (i32, i32) {
    %c0_i32 = arith.constant 0 : i32
    %c0_i32_0 = arith.constant 0 : i32
    return %arg0, %c0_i32 : i32, i32
  }
}

module attributes {stable_mosaic.version = 11 : i64} {
  func.func @_two_mlp_head_kernel(%arg0: i32, %arg1: i32, %arg2: memref<16x1024xf32, #tpu.memory_space<vmem>>, %arg3: memref<1024x128xbf16, #tpu.memory_space<vmem>>, %arg4: memref<1x128xf32, #tpu.memory_space<vmem>>, %arg5: memref<128x128xbf16, #tpu.memory_space<vmem>>, %arg6: memref<1x128xf32, #tpu.memory_space<vmem>>, %arg7: memref<16x128xf32, #tpu.memory_space<vmem>>) attributes {dimension_semantics = [#tpu.dimension_semantics<parallel>, #tpu.dimension_semantics<arbitrary>], iteration_bounds = array<i64: 1, 1>, scalar_prefetch = 0 : i64, scratch_operands = 0 : i64, tpu.core_type = #tpu.core_type<tc>, window_params = [{transform_indices = @transform_0, window_bounds = array<i64: 16, 1024>}, {transform_indices = @transform_1, window_bounds = array<i64: 1024, 128>}, {pipeline_mode = #tpu.pipeline_mode<synchronous>, transform_indices = @transform_2, window_bounds = array<i64: 1, 128>}, {pipeline_mode = #tpu.pipeline_mode<synchronous>, transform_indices = @transform_3, window_bounds = array<i64: 128, 128>}, {pipeline_mode = #tpu.pipeline_mode<synchronous>, transform_indices = @transform_4, window_bounds = array<i64: 1, 128>}, {transform_indices = @transform_5, window_bounds = array<i64: 16, 128>}]} {
    %c0_i32 = arith.constant 0 : i32
    %0 = arith.cmpi eq, %arg1, %c0_i32 : i32
    %1 = arith.extui %0 : i1 to i32
    %c0_i32_0 = arith.constant 0 : i32
    %2 = arith.cmpi ne, %1, %c0_i32_0 : i32
    scf.if %2 {
      %cst_10 = arith.constant 0.000000e+00 : f32
      %13 = vector.broadcast %cst_10 : f32 to vector<16x128xf32>
      %c0_11 = arith.constant 0 : index
      %c0_12 = arith.constant 0 : index
      %14 = vector.load %arg7[%c0_11, %c0_12] : memref<16x128xf32, #tpu.memory_space<vmem>>, vector<16x128xf32>
      tpu.vector_store %arg7[%c0_11, %c0_12], %13 {strides = array<i32>} : memref<16x128xf32, #tpu.memory_space<vmem>>, vector<16x128xf32>,
    } else {
    }
    %c0 = arith.constant 0 : index
    %c0_1 = arith.constant 0 : index
    %3 = vector.load %arg2[%c0, %c0_1] : memref<16x1024xf32, #tpu.memory_space<vmem>>, vector<16x1024xf32>
    %4 = arith.truncf %3 : vector<16x1024xf32> to vector<16x1024xbf16>
    %c0_2 = arith.constant 0 : index
    %c0_3 = arith.constant 0 : index
    %5 = vector.load %arg7[%c0_2, %c0_3] : memref<16x128xf32, #tpu.memory_space<vmem>>, vector<16x128xf32>
    %c0_4 = arith.constant 0 : index
    %c0_5 = arith.constant 0 : index
    %6 = vector.load %arg3[%c0_4, %c0_5] : memref<1024x128xbf16, #tpu.memory_space<vmem>>, vector<1024x128xbf16>
    %cst = arith.constant dense<0.000000e+00> : vector<16x128xf32>
    %7 = tpu.matmul %4, %6, %cst {dimension_numbers = #tpu.dot_dimension_numbers<[1], [0], [0], [1], [0, 0, 1, 1], [], []>} : vector<16x1024xbf16>, vector<1024x128xbf16>, vector<16x128xf32> -> vector<16x128xf32>
    %8 = arith.addf %5, %7 : vector<16x128xf32>
    %c0_6 = arith.constant 0 : index
    %c0_7 = arith.constant 0 : index
    %9 = vector.load %arg7[%c0_6, %c0_7] : memref<16x128xf32, #tpu.memory_space<vmem>>, vector<16x128xf32>
    tpu.vector_store %arg7[%c0_6, %c0_7], %8 {strides = array<i32>} : memref<16x128xf32, #tpu.memory_space<vmem>>, vector<16x128xf32>,
    %c0_i32_8 = arith.constant 0 : i32
    %10 = arith.cmpi eq, %arg1, %c0_i32_8 : i32
    %11 = arith.extui %10 : i1 to i32
    %c0_i32_9 = arith.constant 0 : i32
    %12 = arith.cmpi ne, %11, %c0_i32_9 : i32
    scf.if %12 {
      %c0_10 = arith.constant 0 : index
      %c0_11 = arith.constant 0 : index
      %13 = vector.load %arg7[%c0_10, %c0_11] : memref<16x128xf32, #tpu.memory_space<vmem>>, vector<16x128xf32>
      %c0_12 = arith.constant 0 : index
      %c0_13 = arith.constant 0 : index
      %14 = vector.load %arg4[%c0_12, %c0_13] : memref<1x128xf32, #tpu.memory_space<vmem>>, vector<1x128xf32>
      %15 = vector.broadcast %14 : vector<1x128xf32> to vector<16x128xf32>
      %16 = arith.addf %13, %15 : vector<16x128xf32>
      %cst_14 = arith.constant 0.000000e+00 : f32
      %17 = vector.broadcast %cst_14 : f32 to vector<16x128xf32>
      %18 = arith.maximumf %16, %17 : vector<16x128xf32>
      %19 = arith.truncf %18 : vector<16x128xf32> to vector<16x128xbf16>
      %c0_15 = arith.constant 0 : index
      %c0_16 = arith.constant 0 : index
      %20 = vector.load %arg5[%c0_15, %c0_16] : memref<128x128xbf16, #tpu.memory_space<vmem>>, vector<128x128xbf16>
      %cst_17 = arith.constant dense<0.000000e+00> : vector<16x128xf32>
      %21 = tpu.matmul %19, %20, %cst_17 {dimension_numbers = #tpu.dot_dimension_numbers<[1], [0], [0], [1], [0, 0, 1, 1], [], []>} : vector<16x128xbf16>, vector<128x128xbf16>, vector<16x128xf32> -> vector<16x128xf32>
      %c0_18 = arith.constant 0 : index
      %c0_19 = arith.constant 0 : index
      %22 = vector.load %arg6[%c0_18, %c0_19] : memref<1x128xf32, #tpu.memory_space<vmem>>, vector<1x128xf32>
      %23 = vector.broadcast %22 : vector<1x128xf32> to vector<16x128xf32>
      %24 = arith.addf %21, %23 : vector<16x128xf32>
      %cst_20 = arith.constant 0.000000e+00 : f32
      %25 = vector.broadcast %cst_20 : f32 to vector<16x128xf32>
      %26 = arith.maximumf %24, %25 : vector<16x128xf32>
      %c0_21 = arith.constant 0 : index
      %c0_22 = arith.constant 0 : index
      %27 = vector.load %arg7[%c0_21, %c0_22] : memref<16x128xf32, #tpu.memory_space<vmem>>, vector<16x128xf32>
      tpu.vector_store %arg7[%c0_21, %c0_22], %26 {strides = array<i32>} : memref<16x128xf32, #tpu.memory_space<vmem>>, vector<16x128xf32>,
    } else {
    }
    return
  }
  func.func @transform_0(%arg0: i32, %arg1: i32) -> (i32, i32) {
    %c0_i32 = arith.constant 0 : i32
    return %arg0, %arg1 : i32, i32
  }
  func.func @transform_1(%arg0: i32, %arg1: i32) -> (i32, i32) {
    %c0_i32 = arith.constant 0 : i32
    %c0_i32_0 = arith.constant 0 : i32
    return %arg1, %c0_i32 : i32, i32
  }
  func.func @transform_2(%arg0: i32, %arg1: i32) -> (i32, i32) {
    %c0_i32 = arith.constant 0 : i32
    %c0_i32_0 = arith.constant 0 : i32
    %c0_i32_1 = arith.constant 0 : i32
    return %c0_i32, %c0_i32_0 : i32, i32
  }
  func.func @transform_3(%arg0: i32, %arg1: i32) -> (i32, i32) {
    %c0_i32 = arith.constant 0 : i32
    %c0_i32_0 = arith.constant 0 : i32
    %c0_i32_1 = arith.constant 0 : i32
    return %c0_i32, %c0_i32_0 : i32, i32
  }
  func.func @transform_4(%arg0: i32, %arg1: i32) -> (i32, i32) {
    %c0_i32 = arith.constant 0 : i32
    %c0_i32_0 = arith.constant 0 : i32
    %c0_i32_1 = arith.constant 0 : i32
    return %c0_i32, %c0_i32_0 : i32, i32
  }
  func.func @transform_5(%arg0: i32, %arg1: i32) -> (i32, i32) {
    %c0_i32 = arith.constant 0 : i32
    %c0_i32_0 = arith.constant 0 : i32
    return %arg0, %c0_i32 : i32, i32
  }
}

</mosaic_0001>

<bundles_post_ra>
// kernel: tpu_custom_call.1
= control target key start
LH: loop header
LB: loop body
LE: loop exit
PB: predicated region body
PF: predicated region fallthrough
CT: control target
= control target key end

     0   :  { %10 = vsyncpa [#allocation3], 0  ;;  %s1396_s0 = inlined_call_operand.hbm [shape: f32[16,1024], index: 0, kind: input, shape index: {}]   ;;  %s1397_s1 = inlined_call_operand.hbm [shape: bf16[1024,128], index: 1, kind: input, shape index: {}]   ;;  %s1398_s2 = inlined_call_operand.vmem [shape: f32[1,128], index: 2, kind: input, shape index: {}]   ;;  %s1399_s3 = inlined_call_operand.hbm [shape: bf16[128,128], index: 3, kind: input, shape index: {}]   ;;  %s1400_s4 = inlined_call_operand.vmem [shape: f32[1,128], index: 4, kind: input, shape index: {}]   ;;  %s1401_s5 = inlined_call_operand.hbm [shape: f32[16,128], index: 5, kind: output, shape index: {}]  }
   0x1   :  { %11 = vsyncpa [#allocation6], 0 }
   0x2   :  { %12 = vsyncpa [#allocation4], 0  ;;  %s1294_s18 = smov [#allocation5]   ;;  %s1200_s22 = scalar_lea.hbm %s1397_s1, 8192 }
   0x3   :  { %s30_s19 = sshll.u32 %s1294_s18, 4  ;;  %p1201_p0 = scmp.ne.s32.totalorder %s1397_s1, %s1200_s22  ;;  %s31_s19 = int_to_ptr.vmem [resolvable:$true] %s30_s19 }
   0x4   :  { %p1204_p1 = scmp.lt.u32.totalorder %s1200_s22, %s1397_s1 }
   0x6   :  { %p1206_p2 = pnand %p1204_p1, %p1201_p0 }
   0x8   :  { %1209 = shalt.err (!%p1206_p2)
}
   0x9   :  { %s1210_s27 = scalar_lea.vmem %s31_s19, 8192  ;;  %p1215_p4 = scmp.lt.s32.totalorder %s31_s19, %s31_s19 }
   0xa   :  { %p1211_p3 = scmp.ne.s32.totalorder %s31_s19, %s1210_s27  ;;  %p1216_p5 = scmp.lt.s32.totalorder %s1210_s27, %s1210_s27 }
   0xc   :  { %p1217_p6 = por %p1216_p5, %p1215_p4 }
   0xe   :  { %p1218_p7 = pnand %p1217_p6, %p1211_p3 }
  0x10   :  { %1221 = shalt.err (!%p1218_p7)
}
  0x11   :  { %s1295_s28 = smov 64   ;;  %s1296_s29 = smov 4  }
  0x12   :  { %36 = dma.hbm_to_vmem [thread:$0]  %s1397_s1, 8192, %s31_s19, [#allocation6], %s1295_s28, %s1295_s28, %s1296_s29  }
  0x13   :  { %s1297_s7 = smov [#allocation2]   ;;  %s1222_s11 = scalar_lea.hbm %s1396_s0, 2048 }
  0x14   :  { %s18_s8 = sshll.u32 %s1297_s7, 4  ;;  %p1223_p8 = scmp.ne.s32.totalorder %s1396_s0, %s1222_s11  ;;  %s19_s8 = int_to_ptr.vmem [resolvable:$true] %s18_s8 }
  0x15   :  { %p1226_p9 = scmp.lt.u32.totalorder %s1222_s11, %s1396_s0 }
  0x17   :  { %p1228_p10 = pnand %p1226_p9, %p1223_p8 }
  0x19   :  { %1231 = shalt.err (!%p1228_p10)
}
  0x1a   :  { %s1232_s16 = scalar_lea.vmem %s19_s8, 2048  ;;  %p1237_p12 = scmp.lt.s32.totalorder %s19_s8, %s19_s8 }
  0x1b   :  { %p1233_p11 = scmp.ne.s32.totalorder %s19_s8, %s1232_s16  ;;  %p1238_p13 = scmp.lt.s32.totalorder %s1232_s16, %s1232_s16 }
  0x1d   :  { %p1239_p0 = por %p1238_p13, %p1237_p12 }
  0x1f   :  { %p1240_p1 = pnand %p1239_p0, %p1233_p11 }
  0x21   :  { %1243 = shalt.err (!%p1240_p1)
}
  0x22   :  { %s1298_s1 = smov 1024   ;;  %s1299_s19 = smov [#allocation7]  }
  0x23   :  { %24 = dma.hbm_to_vmem [thread:$0]  %s1396_s0, 2048, %s19_s8, [#allocation3], %s1298_s1, %s1298_s1, %s1295_s28  }
  0x24   :  { %s44_s20 = sshll.u32 %s1299_s19, 4  ;;  %s1244_s23 = scalar_lea.hbm %s1399_s3, 1024  ;;  %s45_s20 = int_to_ptr.vmem [resolvable:$true] %s44_s20 }
  0x25   :  { %p1245_p2 = scmp.ne.s32.totalorder %s1399_s3, %s1244_s23  ;;  %p1248_p3 = scmp.lt.u32.totalorder %s1244_s23, %s1399_s3 }
  0x27   :  { %p1250_p4 = pnand %p1248_p3, %p1245_p2 }
  0x29   :  { %1253 = shalt.err (!%p1250_p4)
}
  0x2a   :  { %s1254_s30 = scalar_lea.vmem %s45_s20, 1024  ;;  %p1259_p6 = scmp.lt.s32.totalorder %s45_s20, %s45_s20 }
  0x2b   :  { %p1255_p5 = scmp.ne.s32.totalorder %s45_s20, %s1254_s30  ;;  %p1260_p7 = scmp.lt.s32.totalorder %s1254_s30, %s1254_s30 }
  0x2d   :  { %p1261_p8 = por %p1260_p7, %p1259_p6 }
  0x2f   :  { %p1262_p9 = pnand %p1261_p8, %p1255_p5 }
  0x31   :  { %1265 = shalt.err (!%p1262_p9)
}
  0x32   :  { %50 = dma.hbm_to_vmem [thread:$0]  %s1399_s3, 1024, %s45_s20, [#allocation6], %s1295_s28, %s1295_s28, %s1296_s29  }
  0x33   :  { %1288 = dma.done.wait [#allocation3], 2048  }
  0x34   :  { %1289 = vsyncadd [#allocation3], 4294965248 }
  0x35   :  { %1290 = dma.done.wait [#allocation6], 9216  }
  0x36   :  { %1291 = vsyncadd [#allocation6], 4294958080  ;;  %v1128_v0 = vld [vmem:[#allocation5 + $0x40] sm:$0xff]   ;;  %v1132_v4 = vld [vmem:[#allocation5 + $0x48] sm:$0xff]   ;;  %vm1301_vm0 = vmmov 0   ;;  %s1302_s8 = smov [#allocation8]  }
  0x37   :  { %v1129_v1 = vld [vmem:[#allocation5 + $0xc0] sm:$0xff]   ;;  %1000 = vmatprep.subr.bf16.mxu0 %v1128_v0  ;;  %v1133_v5 = vld [vmem:[#allocation5 + $0xc8] sm:$0xff]   ;;  %v1136_v8 = vld [vmem:[#allocation5 + $0x50] sm:$0xff]   ;;  %s913_s9 = sshll.u32 %s1302_s8, 4  ;;  %s914_s9 = int_to_ptr.vmem [resolvable:$true] %s913_s9 }
  0x38   :  { %v1130_v2 = vld [vmem:[#allocation5] sm:$0xff]   ;;  %1022 = vmatprep.subr.bf16.mxu1 %v1129_v1  ;;  %v1134_v6 = vld [vmem:[#allocation5 + $0x8] sm:$0xff]   ;;  %v1137_v9 = vld [vmem:[#allocation5 + $0xd0] sm:$0xff]   ;;  %p1271_p11 = scmp.lt.s32.totalorder %s914_s9, %s914_s9 }
  0x39   :  { %v1131_v3 = vld [vmem:[#allocation5 + $0x80] sm:$0xff]   ;;  %1001 = vmatpush3.bf16.msra.mxu0 %v1130_v2  ;;  %v1135_v7 = vld [vmem:[#allocation5 + $0x88] sm:$0xff]   ;;  %v1138_v10 = vld [vmem:[#allocation5 + $0x10] sm:$0xff]  }
  0x3a   :  { %1023 = vmatpush3.bf16.msra.mxu1 %v1131_v3  ;;  %1002 = vmatprep.subr.bf16.mxu0 %v1132_v4  ;;  %v1139_v11 = vld [vmem:[#allocation5 + $0x90] sm:$0xff]   ;;  %v1140_v12 = vld [vmem:[#allocation5 + $0x58] sm:$0xff]   ;;  %v1144_v16 = vld [vmem:[#allocation5 + $0x60] sm:$0xff]  }
  0x3b   :  { %1024 = vmatprep.subr.bf16.mxu1 %v1133_v5  ;;  %v1141_v13 = vld [vmem:[#allocation5 + $0xd8] sm:$0xff]   ;;  %v1145_v17 = vld [vmem:[#allocation5 + $0xe0] sm:$0xff]   ;;  %v1148_v20 = vld [vmem:[#allocation5 + $0x68] sm:$0xff]  }
  0x3c   :  { %v1142_v14 = vld [vmem:[#allocation5 + $0x18] sm:$0xff]   ;;  %v1146_v18 = vld [vmem:[#allocation5 + $0x20] sm:$0xff]   ;;  %v1149_v21 = vld [vmem:[#allocation5 + $0xe8] sm:$0xff]  }
  0x3d   :  { %1003 = vmatpush3.bf16.msra.mxu0 %v1134_v6  ;;  %v1143_v15 = vld [vmem:[#allocation5 + $0x98] sm:$0xff]   ;;  %v1147_v19 = vld [vmem:[#allocation5 + $0xa0] sm:$0xff]   ;;  %v1150_v22 = vld [vmem:[#allocation5 + $0x28] sm:$0xff]  }
  0x3e   :  { %1025 = vmatpush3.bf16.msra.mxu1 %v1135_v7  ;;  %1004 = vmatprep.subr.bf16.mxu0 %v1136_v8  ;;  %v1151_v23 = vld [vmem:[#allocation5 + $0xa8] sm:$0xff]   ;;  %v1152_v24 = vld [vmem:[#allocation5 + $0x70] sm:$0xff]   ;;  %v1156_v28 = vld [vmem:[#allocation5 + $0x78] sm:$0xff]  }
  0x3f   :  { %1026 = vmatprep.subr.bf16.mxu1 %v1137_v9  ;;  %v1153_v25 = vld [vmem:[#allocation5 + $0xf0] sm:$0xff]   ;;  %v1157_v29 = vld [vmem:[#allocation5 + $0xf8] sm:$0xff]   ;;  %v70_v32 = vld [vmem:[#allocation2 + $0x8] sm:$0xff] }
  0x40   :  { %v1154_v26 = vld [vmem:[#allocation5 + $0x30] sm:$0xff]   ;;  %v1158_v30 = vld [vmem:[#allocation5 + $0x38] sm:$0xff]   ;;  %v78_v33 = vld [vmem:[#allocation2 + $0x48] sm:$0xff] }
  0x41   :  { %1005 = vmatpush3.bf16.msra.mxu0 %v1138_v10  ;;  %v1155_v27 = vld [vmem:[#allocation5 + $0xb0] sm:$0xff]   ;;  %v1159_v31 = vld [vmem:[#allocation5 + $0xb8] sm:$0xff]   ;;  %v86_v35 = vpack.c.bf16 %v78_v33, %v70_v32  ;;  %v69_v37 = vld [vmem:[#allocation2] sm:$0xff] }
  0x42   :  { %1027 = vmatpush3.bf16.msra.mxu1 %v1139_v11  ;;  %1006 = vmatprep.subr.bf16.mxu0 %v1140_v12  ;;  %v72_v34 = vld [vmem:[#allocation2 + $0x18] sm:$0xff]  ;;  %v77_v38 = vld [vmem:[#allocation2 + $0x40] sm:$0xff]  ;;  %v71_v41 = vld [vmem:[#allocation2 + $0x10] sm:$0xff] }
  0x43   :  { %1028 = vmatprep.subr.bf16.mxu1 %v1141_v13  ;;  %v80_v36 = vld [vmem:[#allocation2 + $0x58] sm:$0xff]  ;;  %v85_v40 = vpack.c.bf16 %v77_v38, %v69_v37  ;;  %v79_v42 = vld [vmem:[#allocation2 + $0x50] sm:$0xff]  ;;  %639 = vmatprep.mubr.bf16.mxu0 %v86_v35  ;;  %v1160_v44 = vld [vmem:[#allocation5 + $0x140] sm:$0xff]  }
  0x44   :  { %v88_v39 = vpack.c.bf16 %v80_v36, %v72_v34  ;;  %v87_v43 = vpack.c.bf16 %v79_v42, %v71_v41  ;;  %v1161_v45 = vld [vmem:[#allocation5 + $0x1c0] sm:$0xff]   ;;  %v1164_v48 = vld [vmem:[#allocation5 + $0x148] sm:$0xff]   ;;  %v1168_v52 = vld [vmem:[#allocation5 + $0x150] sm:$0xff]  }
  0x45   :  { %1007 = vmatpush3.bf16.msra.mxu0 %v1142_v14  ;;  %v1162_v46 = vld [vmem:[#allocation5 + $0x100] sm:$0xff]   ;;  %v1165_v49 = vld [vmem:[#allocation5 + $0x1c8] sm:$0xff]   ;;  %v1169_v53 = vld [vmem:[#allocation5 + $0x1d0] sm:$0xff]  }
  0x46   :  { %1029 = vmatpush3.bf16.msra.mxu1 %v1143_v15  ;;  %1008 = vmatprep.subr.bf16.mxu0 %v1144_v16  ;;  %v1163_v47 = vld [vmem:[#allocation5 + $0x180] sm:$0xff]   ;;  %v1166_v50 = vld [vmem:[#allocation5 + $0x108] sm:$0xff]   ;;  %v1170_v54 = vld [vmem:[#allocation5 + $0x110] sm:$0xff]  }
  0x47   :  { %1030 = vmatprep.subr.bf16.mxu1 %v1145_v17  ;;  %680 = vmatprep.mubr.bf16.mxu1 %v88_v39  ;;  %v1167_v51 = vld [vmem:[#allocation5 + $0x188] sm:$0xff]   ;;  %v1171_v55 = vld [vmem:[#allocation5 + $0x190] sm:$0xff]   ;;  %v1172_v56 = vld [vmem:[#allocation5 + $0x158] sm:$0xff]  }
  0x48   :  { %v1173_v57 = vld [vmem:[#allocation5 + $0x1d8] sm:$0xff]   ;;  %v1176_v60 = vld [vmem:[#allocation5 + $0x160] sm:$0xff]   ;;  %v1180_v0 = vld [vmem:[#allocation5 + $0x168] sm:$0xff]  }
  0x49   :  { %1009 = vmatpush3.bf16.msra.mxu0 %v1146_v18  ;;  %v1174_v58 = vld [vmem:[#allocation5 + $0x118] sm:$0xff]   ;;  %v1177_v61 = vld [vmem:[#allocation5 + $0x1e0] sm:$0xff]   ;;  %v1181_v1 = vld [vmem:[#allocation5 + $0x1e8] sm:$0xff]  }
  0x4a   :  { %1031 = vmatpush3.bf16.msra.mxu1 %v1147_v19  ;;  %1010 = vmatprep.subr.bf16.mxu0 %v1148_v20  ;;  %v1175_v59 = vld [vmem:[#allocation5 + $0x198] sm:$0xff]   ;;  %v1178_v62 = vld [vmem:[#allocation5 + $0x120] sm:$0xff]   ;;  %v1182_v2 = vld [vmem:[#allocation5 + $0x128] sm:$0xff]  }
  0x4b   :  { %1032 = vmatprep.subr.bf16.mxu1 %v1149_v21  ;;  %v1179_v63 = vld [vmem:[#allocation5 + $0x1a0] sm:$0xff]   ;;  %v1183_v3 = vld [vmem:[#allocation5 + $0x1a8] sm:$0xff]   ;;  %v1184_v4 = vld [vmem:[#allocation5 + $0x170] sm:$0xff]  }
  0x4c   :  { %v1185_v5 = vld [vmem:[#allocation5 + $0x1f0] sm:$0xff]   ;;  %v1188_v8 = vld [vmem:[#allocation5 + $0x178] sm:$0xff]   ;;  %v74_v12 = vld [vmem:[#allocation2 + $0x28] sm:$0xff] }
  0x4d   :  { %1011 = vmatpush3.bf16.msra.mxu0 %v1150_v22  ;;  %v1186_v6 = vld [vmem:[#allocation5 + $0x130] sm:$0xff]   ;;  %v1189_v9 = vld [vmem:[#allocation5 + $0x1f8] sm:$0xff]   ;;  %v82_v13 = vld [vmem:[#allocation2 + $0x68] sm:$0xff] }
  0x4e   :  { %1033 = vmatpush3.bf16.msra.mxu1 %v1151_v23  ;;  %1012 = vmatprep.subr.bf16.mxu0 %v1152_v24  ;;  %v1187_v7 = vld [vmem:[#allocation5 + $0x1b0] sm:$0xff]   ;;  %v1190_v10 = vld [vmem:[#allocation5 + $0x138] sm:$0xff]   ;;  %v90_v16 = vpack.c.bf16 %v82_v13, %v74_v12  ;;  %v73_v18 = vld [vmem:[#allocation2 + $0x20] sm:$0xff] }
  0x4f   :  { %1034 = vmatprep.subr.bf16.mxu1 %v1153_v25  ;;  %v1191_v11 = vld [vmem:[#allocation5 + $0x1b8] sm:$0xff]   ;;  %v81_v19 = vld [vmem:[#allocation2 + $0x60] sm:$0xff]  ;;  %v75_v20 = vld [vmem:[#allocation2 + $0x30] sm:$0xff]  ;;  %v1300_v25 = vmov 0.0  }
  0x50   :  { %v76_v14 = vld [vmem:[#allocation2 + $0x38] sm:$0xff]  ;;  %v89_v21 = vpack.c.bf16 %v81_v19, %v73_v18  ;;  %v83_v22 = vld [vmem:[#allocation2 + $0x70] sm:$0xff]  ;;  %v1192_v24 = vld [vmem:[#allocation7] sm:$0xff]  }
  0x51   :  { %1013 = vmatpush3.bf16.msra.mxu0 %v1154_v26  ;;  %v84_v15 = vld [vmem:[#allocation2 + $0x78] sm:$0xff]  ;;  %v91_v23 = vpack.c.bf16 %v83_v22, %v75_v20  ;;  %v1193_v26 = vld [vmem:[#allocation7 + $0x8] sm:$0xff]  }
  0x52   :  { %1035 = vmatpush3.bf16.msra.mxu1 %v1155_v27  ;;  %1014 = vmatprep.subr.bf16.mxu0 %v1156_v28  ;;  %v92_v17 = vpack.c.bf16 %v84_v15, %v76_v14  ;;  %v1194_v27 = vld [vmem:[#allocation7 + $0x10] sm:$0xff]   ;;  %v1195_v28 = vld [vmem:[#allocation7 + $0x18] sm:$0xff]  }
  0x53   :  { %1036 = vmatprep.subr.bf16.mxu1 %v1157_v29  ;;  %v1196_v29 = vld [vmem:[#allocation7 + $0x20] sm:$0xff]   ;;  %v1199_v32 = vld [vmem:[#allocation7 + $0x38] sm:$0xff]  }
  0x55   :  { %1015 = vmatpush3.bf16.msra.mxu0 %v1158_v30  ;;  %v1197_v30 = vld [vmem:[#allocation7 + $0x28] sm:$0xff]  }
  0x56   :  { %1037 = vmatpush3.bf16.msra.mxu1 %v1159_v31  ;;  %1044 = vmatprep.subr.bf16.mxu0 %v1160_v44  ;;  %v1198_v31 = vld [vmem:[#allocation7 + $0x30] sm:$0xff]  }
  0x57   :  { %1066 = vmatprep.subr.bf16.mxu1 %v1161_v45 }
  0x58   :  { %640 = vmatmul.mubr.bf16.vlgmr.msra.gmra.mrb[0].mxu0 %v85_v40 }
  0x59   :  { %681 = vmatmul.mubr.bf16.vlgmr.msra.gmra.mrb[0].mxu1 %v87_v43  ;;  %1045 = vmatpush3.bf16.msra.mxu0 %v1162_v46 }
  0x5a   :  { %1067 = vmatpush3.bf16.msra.mxu1 %v1163_v47  ;;  %1046 = vmatprep.subr.bf16.mxu0 %v1164_v48 }
  0x5b   :  { %1068 = vmatprep.subr.bf16.mxu1 %v1165_v49  ;;  %721 = vmatprep.mubr.bf16.mxu0 %v90_v16 }
  0x5c   :  { %762 = vmatprep.mubr.bf16.mxu1 %v92_v17 }
  0x5d   :  { %1047 = vmatpush3.bf16.msra.mxu0 %v1166_v50 }
  0x5e   :  { %1069 = vmatpush3.bf16.msra.mxu1 %v1167_v51  ;;  %1048 = vmatprep.subr.bf16.mxu0 %v1168_v52 }
  0x5f   :  { %1070 = vmatprep.subr.bf16.mxu1 %v1169_v53 }
  0x61   :  { %1049 = vmatpush3.bf16.msra.mxu0 %v1170_v54 }
  0x62   :  { %1071 = vmatpush3.bf16.msra.mxu1 %v1171_v55  ;;  %1050 = vmatprep.subr.bf16.mxu0 %v1172_v56 }
  0x63   :  { %1072 = vmatprep.subr.bf16.mxu1 %v1173_v57 }
  0x65   :  { %1051 = vmatpush3.bf16.msra.mxu0 %v1174_v58 }
  0x66   :  { %1073 = vmatpush3.bf16.msra.mxu1 %v1175_v59  ;;  %1052 = vmatprep.subr.bf16.mxu0 %v1176_v60 }
  0x67   :  { %1074 = vmatprep.subr.bf16.mxu1 %v1177_v61 }
  0x69   :  { %1053 = vmatpush3.bf16.msra.mxu0 %v1178_v62  ;;  %v990_v62 = vld [vmem:[%s1398_s2] ss:$0 sm:$0xff]  ;;  %s1266_s2 = scalar_lea.vmem %s914_s9, 256 }
  0x6a   :  { %1075 = vmatpush3.bf16.msra.mxu1 %v1179_v63  ;;  %1054 = vmatprep.subr.bf16.mxu0 %v1180_v0  ;;  %p1267_p10 = scmp.ne.s32.totalorder %s914_s9, %s1266_s2  ;;  %p1272_p12 = scmp.lt.s32.totalorder %s1266_s2, %s1266_s2 }
  0x6b   :  { %1076 = vmatprep.subr.bf16.mxu1 %v1181_v1 }
  0x6c   :  { %p1273_p13 = por %p1272_p12, %p1271_p11 }
  0x6d   :  { %1055 = vmatpush3.bf16.msra.mxu0 %v1182_v2 }
  0x6e   :  { %1077 = vmatpush3.bf16.msra.mxu1 %v1183_v3  ;;  %1056 = vmatprep.subr.bf16.mxu0 %v1184_v4  ;;  %p1274_p0 = pnand %p1273_p13, %p1267_p10 }
  0x6f   :  { %1078 = vmatprep.subr.bf16.mxu1 %v1185_v5  ;;  %v991_v5 = vld [vmem:[%s1400_s4] ss:$0 sm:$0xff] }
  0x71   :  { %1057 = vmatpush3.bf16.msra.mxu0 %v1186_v6 }
  0x72   :  { %1079 = vmatpush3.bf16.msra.mxu1 %v1187_v7  ;;  %1058 = vmatprep.subr.bf16.mxu0 %v1188_v8 }
  0x73   :  { %1080 = vmatprep.subr.bf16.mxu1 %v1189_v9 }
  0x75   :  { %1059 = vmatpush3.bf16.msra.mxu0 %v1190_v10 }
  0x76   :  { %1081 = vmatpush3.bf16.msra.mxu1 %v1191_v11  ;;  %1097 = vmatprep.subr.bf16.mxu0 %v1300_v25 }
  0x78   :  { %722 = vmatmul.mubr.bf16.vlgmr.msra.gmra.mrb[4].mxu0 %v89_v21 }
  0x79   :  { %763 = vmatmul.mubr.bf16.vlgmr.msra.gmra.mrb[4].mxu1 %v91_v23  ;;  %1098 = vmatpush3.bf16.msra.mxu0 %v1192_v24 }
  0x7a   :  { %1099 = vmatprep.subr.bf16.mxu0 %v1300_v25  ;;  %1113 = vmatprep.mubr.msk.bf16.mxu0 %vm1301_vm0, %v1300_v25 }
  0x7d   :  { %1100 = vmatpush3.bf16.msra.mxu0 %v1193_v26 }
  0x7e   :  { %1101 = vmatprep.subr.bf16.mxu0 %v1300_v25 }
  0x81   :  { %1102 = vmatpush3.bf16.msra.mxu0 %v1194_v27 }
  0x82   :  { %1103 = vmatprep.subr.bf16.mxu0 %v1300_v25 }
  0x85   :  { %1104 = vmatpush3.bf16.msra.mxu0 %v1195_v28 }
  0x86   :  { %1105 = vmatprep.subr.bf16.mxu0 %v1300_v25 }
  0x89   :  { %1106 = vmatpush3.bf16.msra.mxu0 %v1196_v29 }
  0x8a   :  { %1107 = vmatprep.subr.bf16.mxu0 %v1300_v25 }
  0x8d   :  { %1108 = vmatpush3.bf16.msra.mxu0 %v1197_v30 }
  0x8e   :  { %1109 = vmatprep.subr.bf16.mxu0 %v1300_v25 }
  0x91   :  { %1110 = vmatpush3.bf16.msra.mxu0 %v1198_v31 }
  0x92   :  { %1111 = vmatprep.subr.bf16.mxu0 %v1300_v25 }
  0x95   :  { %1112 = vmatpush3.bf16.msra.mxu0 %v1199_v32 }
 0x12b   :  { %v1016_v33 = vpop.f32.mrb[0].mxu0 }
 0x12c   :  { %v1038_v34 = vpop.f32.mrb[0].mxu1  ;;  %v1017_v35 = vpop.f32.mrb[1].mxu0 }
 0x12d   :  { %v1018_v36 = vadd.f32 %v1017_v35, %v1016_v33  ;;  %v1039_v37 = vpop.f32.mrb[1].mxu1  ;;  %v1019_v38 = vpop.f32.mrb[2].mxu0 }
 0x12e   :  { %v1040_v39 = vadd.f32 %v1039_v37, %v1038_v34  ;;  %v1041_v40 = vpop.f32.mrb[2].mxu1  ;;  %v1020_v41 = vpop.f32.mrb[3].mxu0 }
 0x12f   :  { %v1021_v42 = vadd.f32 %v1020_v41, %v1019_v38  ;;  %v1042_v43 = vpop.f32.mrb[3].mxu1 }
 0x130   :  { %v683_v44 = vadd.f32 %v1040_v39, %v1018_v36  ;;  %v1043_v45 = vadd.f32 %v1042_v43, %v1041_v40 }
 0x132   :  { %v686_v46 = vadd.f32 %v1043_v45, %v1021_v42 }
 0x14b   :  { %v1060_v47 = vpop.f32.mrb[4].mxu0 }
 0x14c   :  { %v1082_v48 = vpop.f32.mrb[4].mxu1  ;;  %v1061_v49 = vpop.f32.mrb[5].mxu0 }
 0x14d   :  { %v1062_v50 = vadd.f32 %v1061_v49, %v1060_v47  ;;  %v1083_v51 = vpop.f32.mrb[5].mxu1  ;;  %v1063_v52 = vpop.f32.mrb[6].mxu0 }
 0x14e   :  { %v1084_v53 = vadd.f32 %v1083_v51, %v1082_v48  ;;  %v1085_v54 = vpop.f32.mrb[6].mxu1  ;;  %v1064_v55 = vpop.f32.mrb[7].mxu0 }
 0x14f   :  { %v724_v56 = vadd.f32 %v1062_v50, %v683_v44  ;;  %v1065_v57 = vadd.f32 %v1064_v55, %v1063_v52  ;;  %v1086_v58 = vpop.f32.mrb[7].mxu1 }
 0x150   :  { %v1087_v59 = vadd.f32 %v1086_v58, %v1085_v54 }
 0x151   :  { %v765_v60 = vadd.f32 %v1084_v53, %v724_v56  ;;  %v727_v61 = vadd.f32 %v1065_v57, %v686_v46 }
 0x153   :  { %v768_v63 = vadd.f32 %v1087_v59, %v727_v61  ;;  %v787_v0 = vadd.f32 %v990_v62, %v765_v60 }
 0x155   :  { %v788_v1 = vadd.f32 %v990_v62, %v768_v63  ;;  %v789_v2 = vmax.f32 %v787_v0, 0.0 }
 0x157   :  { %v790_v3 = vmax.f32 %v788_v1, 0.0 }
 0x159   :  { %v791_v4 = vpack.c.bf16 %v790_v3, %v789_v2 }
 0x15b   :  { %1114 = vmatmul.mubr.bf16.vlgmr.msra.gmra.mrb[8].mxu0 %v791_v4 }
 0x22e   :  { %v897_v6 = vpop.f32.mrb[8].mxu0 }
 0x22f   :  { %v898_v7 = vadd.f32 %v991_v5, %v897_v6  ;;  %v1115_v8 = vpop.f32.mrb[9].mxu0 }
 0x230   :  { %v900_v9 = vpop.f32.mrb[10].mxu0 }
 0x231   :  { %v904_v10 = vmax.f32 %v898_v7, 0.0  ;;  %v901_v11 = vadd.f32 %v991_v5, %v900_v9  ;;  %v1116_v12 = vpop.f32.mrb[11].mxu0 }
 0x233   :  { %906 = vst [vmem:[#allocation8] sm:$0xff] %v904_v10  ;;  %v905_v13 = vmax.f32 %v901_v11, 0.0 }
 0x235   :  { %907 = vst [vmem:[#allocation8 + $0x8] sm:$0xff] %v905_v13 }
 0x236   :  { %1277 = shalt.err (!%p1274_p0)
}
 0x237   :  { %s1278_s11 = scalar_lea.hbm %s1401_s5, 256 }
 0x238   :  { %p1279_p1 = scmp.ne.s32.totalorder %s1401_s5, %s1278_s11  ;;  %p1282_p2 = scmp.lt.u32.totalorder %s1278_s11, %s1401_s5 }
 0x23a   :  { %p1284_p3 = pnand %p1282_p2, %p1279_p1 }
 0x23c   :  { %1287 = shalt.err (!%p1284_p3)
}
 0x23d   :  { %s1303_s16 = smov 128   ;;  %s1304_s1 = smov 8  }
 0x23e   :  { %919 = dma.vmem_to_hbm [thread:$0]  %s914_s9, 256, %s1401_s5, [#allocation4], %s1303_s16, %s1303_s16, %s1304_s1  }
 0x23f   :  { %1292 = dma.done.wait [#allocation4], 256  }
 0x240   :  { %1293 = vsyncadd [#allocation4], 4294967040 }
 0x241   :  { %923 = vsyncpa [#allocation3], 1 }
 0x242   :  { %924 = vsyncpa [#allocation6], 1 }
 0x243   :  { %925 = vsyncpa [#allocation4], 1 }

// kernel: tpu_custom_call.1
= control target key start
LH: loop header
LB: loop body
LE: loop exit
PB: predicated region body
PF: predicated region fallthrough
CT: control target
= control target key end

     0   :  { %10 = vsyncpa [#allocation3], 0  ;;  %s1396_s0 = inlined_call_operand.hbm [shape: f32[16,1024], index: 0, kind: input, shape index: {}]   ;;  %s1397_s1 = inlined_call_operand.hbm [shape: bf16[1024,128], index: 1, kind: input, shape index: {}]   ;;  %s1398_s2 = inlined_call_operand.vmem [shape: f32[1,128], index: 2, kind: input, shape index: {}]   ;;  %s1399_s3 = inlined_call_operand.hbm [shape: bf16[128,128], index: 3, kind: input, shape index: {}]   ;;  %s1400_s4 = inlined_call_operand.vmem [shape: f32[1,128], index: 4, kind: input, shape index: {}]   ;;  %s1401_s5 = inlined_call_operand.hbm [shape: f32[16,128], index: 5, kind: output, shape index: {}]  }
   0x1   :  { %11 = vsyncpa [#allocation6], 0 }
   0x2   :  { %12 = vsyncpa [#allocation4], 0  ;;  %s1294_s18 = smov [#allocation5]   ;;  %s1200_s22 = scalar_lea.hbm %s1397_s1, 8192 }
   0x3   :  { %s30_s19 = sshll.u32 %s1294_s18, 4  ;;  %p1201_p0 = scmp.ne.s32.totalorder %s1397_s1, %s1200_s22  ;;  %s31_s19 = int_to_ptr.vmem [resolvable:$true] %s30_s19 }
   0x4   :  { %p1204_p1 = scmp.lt.u32.totalorder %s1200_s22, %s1397_s1 }
   0x6   :  { %p1206_p2 = pnand %p1204_p1, %p1201_p0 }
   0x8   :  { %1209 = shalt.err (!%p1206_p2)
}
   0x9   :  { %s1210_s27 = scalar_lea.vmem %s31_s19, 8192  ;;  %p1215_p4 = scmp.lt.s32.totalorder %s31_s19, %s31_s19 }
   0xa   :  { %p1211_p3 = scmp.ne.s32.totalorder %s31_s19, %s1210_s27  ;;  %p1216_p5 = scmp.lt.s32.totalorder %s1210_s27, %s1210_s27 }
   0xc   :  { %p1217_p6 = por %p1216_p5, %p1215_p4 }
   0xe   :  { %p1218_p7 = pnand %p1217_p6, %p1211_p3 }
  0x10   :  { %1221 = shalt.err (!%p1218_p7)
}
  0x11   :  { %s1295_s28 = smov 64   ;;  %s1296_s29 = smov 4  }
  0x12   :  { %36 = dma.hbm_to_vmem [thread:$0]  %s1397_s1, 8192, %s31_s19, [#allocation6], %s1295_s28, %s1295_s28, %s1296_s29  }
  0x13   :  { %s1297_s7 = smov [#allocation2]   ;;  %s1222_s11 = scalar_lea.hbm %s1396_s0, 2048 }
  0x14   :  { %s18_s8 = sshll.u32 %s1297_s7, 4  ;;  %p1223_p8 = scmp.ne.s32.totalorder %s1396_s0, %s1222_s11  ;;  %s19_s8 = int_to_ptr.vmem [resolvable:$true] %s18_s8 }
  0x15   :  { %p1226_p9 = scmp.lt.u32.totalorder %s1222_s11, %s1396_s0 }
  0x17   :  { %p1228_p10 = pnand %p1226_p9, %p1223_p8 }
  0x19   :  { %1231 = shalt.err (!%p1228_p10)
}
  0x1a   :  { %s1232_s16 = scalar_lea.vmem %s19_s8, 2048  ;;  %p1237_p12 = scmp.lt.s32.totalorder %s19_s8, %s19_s8 }
  0x1b   :  { %p1233_p11 = scmp.ne.s32.totalorder %s19_s8, %s1232_s16  ;;  %p1238_p13 = scmp.lt.s32.totalorder %s1232_s16, %s1232_s16 }
  0x1d   :  { %p1239_p0 = por %p1238_p13, %p1237_p12 }
  0x1f   :  { %p1240_p1 = pnand %p1239_p0, %p1233_p11 }
  0x21   :  { %1243 = shalt.err (!%p1240_p1)
}
  0x22   :  { %s1298_s1 = smov 1024   ;;  %s1299_s19 = smov [#allocation7]  }
  0x23   :  { %24 = dma.hbm_to_vmem [thread:$0]  %s1396_s0, 2048, %s19_s8, [#allocation3], %s1298_s1, %s1298_s1, %s1295_s28  }
  0x24   :  { %s44_s20 = sshll.u32 %s1299_s19, 4  ;;  %s1244_s23 = scalar_lea.hbm %s1399_s3, 1024  ;;  %s45_s20 = int_to_ptr.vmem [resolvable:$true] %s44_s20 }
  0x25   :  { %p1245_p2 = scmp.ne.s32.totalorder %s1399_s3, %s1244_s23  ;;  %p1248_p3 = scmp.lt.u32.totalorder %s1244_s23, %s1399_s3 }
  0x27   :  { %p1250_p4 = pnand %p1248_p3, %p1245_p2 }
  0x29   :  { %1253 = shalt.err (!%p1250_p4)
}
  0x2a   :  { %s1254_s30 = scalar_lea.vmem %s45_s20, 1024  ;;  %p1259_p6 = scmp.lt.s32.totalorder %s45_s20, %s45_s20 }
  0x2b   :  { %p1255_p5 = scmp.ne.s32.totalorder %s45_s20, %s1254_s30  ;;  %p1260_p7 = scmp.lt.s32.totalorder %s1254_s30, %s1254_s30 }
  0x2d   :  { %p1261_p8 = por %p1260_p7, %p1259_p6 }
  0x2f   :  { %p1262_p9 = pnand %p1261_p8, %p1255_p5 }
  0x31   :  { %1265 = shalt.err (!%p1262_p9)
}
  0x32   :  { %50 = dma.hbm_to_vmem [thread:$0]  %s1399_s3, 1024, %s45_s20, [#allocation6], %s1295_s28, %s1295_s28, %s1296_s29  }
  0x33   :  { %1288 = dma.done.wait [#allocation3], 2048  }
  0x34   :  { %1289 = vsyncadd [#allocation3], 4294965248 }
  0x35   :  { %1290 = dma.done.wait [#allocation6], 9216  }
  0x36   :  { %1291 = vsyncadd [#allocation6], 4294958080  ;;  %v1128_v0 = vld [vmem:[#allocation5 + $0x40] sm:$0xff]   ;;  %v1132_v4 = vld [vmem:[#allocation5 + $0x48] sm:$0xff]   ;;  %vm1301_vm0 = vmmov 0   ;;  %s1302_s8 = smov [#allocation8]  }
  0x37   :  { %v1129_v1 = vld [vmem:[#allocation5 + $0xc0] sm:$0xff]   ;;  %1000 = vmatprep.subr.bf16.mxu0 %v1128_v0  ;;  %v1133_v5 = vld [vmem:[#allocation5 + $0xc8] sm:$0xff]   ;;  %v1136_v8 = vld [vmem:[#allocation5 + $0x50] sm:$0xff]   ;;  %s913_s9 = sshll.u32 %s1302_s8, 4  ;;  %s914_s9 = int_to_ptr.vmem [resolvable:$true] %s913_s9 }
  0x38   :  { %v1130_v2 = vld [vmem:[#allocation5] sm:$0xff]   ;;  %1022 = vmatprep.subr.bf16.mxu1 %v1129_v1  ;;  %v1134_v6 = vld [vmem:[#allocation5 + $0x8] sm:$0xff]   ;;  %v1137_v9 = vld [vmem:[#allocation5 + $0xd0] sm:$0xff]   ;;  %p1271_p11 = scmp.lt.s32.totalorder %s914_s9, %s914_s9 }
  0x39   :  { %v1131_v3 = vld [vmem:[#allocation5 + $0x80] sm:$0xff]   ;;  %1001 = vmatpush3.bf16.msra.mxu0 %v1130_v2  ;;  %v1135_v7 = vld [vmem:[#allocation5 + $0x88] sm:$0xff]   ;;  %v1138_v10 = vld [vmem:[#allocation5 + $0x10] sm:$0xff]  }
  0x3a   :  { %1023 = vmatpush3.bf16.msra.mxu1 %v1131_v3  ;;  %1002 = vmatprep.subr.bf16.mxu0 %v1132_v4  ;;  %v1139_v11 = vld [vmem:[#allocation5 + $0x90] sm:$0xff]   ;;  %v1140_v12 = vld [vmem:[#allocation5 + $0x58] sm:$0xff]   ;;  %v1144_v16 = vld [vmem:[#allocation5 + $0x60] sm:$0xff]  }
  0x3b   :  { %1024 = vmatprep.subr.bf16.mxu1 %v1133_v5  ;;  %v1141_v13 = vld [vmem:[#allocation5 + $0xd8] sm:$0xff]   ;;  %v1145_v17 = vld [vmem:[#allocation5 + $0xe0] sm:$0xff]   ;;  %v1148_v20 = vld [vmem:[#allocation5 + $0x68] sm:$0xff]  }
  0x3c   :  { %v1142_v14 = vld [vmem:[#allocation5 + $0x18] sm:$0xff]   ;;  %v1146_v18 = vld [vmem:[#allocation5 + $0x20] sm:$0xff]   ;;  %v1149_v21 = vld [vmem:[#allocation5 + $0xe8] sm:$0xff]  }
  0x3d   :  { %1003 = vmatpush3.bf16.msra.mxu0 %v1134_v6  ;;  %v1143_v15 = vld [vmem:[#allocation5 + $0x98] sm:$0xff]   ;;  %v1147_v19 = vld [vmem:[#allocation5 + $0xa0] sm:$0xff]   ;;  %v1150_v22 = vld [vmem:[#allocation5 + $0x28] sm:$0xff]  }
  0x3e   :  { %1025 = vmatpush3.bf16.msra.mxu1 %v1135_v7  ;;  %1004 = vmatprep.subr.bf16.mxu0 %v1136_v8  ;;  %v1151_v23 = vld [vmem:[#allocation5 + $0xa8] sm:$0xff]   ;;  %v1152_v24 = vld [vmem:[#allocation5 + $0x70] sm:$0xff]   ;;  %v1156_v28 = vld [vmem:[#allocation5 + $0x78] sm:$0xff]  }
  0x3f   :  { %1026 = vmatprep.subr.bf16.mxu1 %v1137_v9  ;;  %v1153_v25 = vld [vmem:[#allocation5 + $0xf0] sm:$0xff]   ;;  %v1157_v29 = vld [vmem:[#allocation5 + $0xf8] sm:$0xff]   ;;  %v70_v32 = vld [vmem:[#allocation2 + $0x8] sm:$0xff] }
  0x40   :  { %v1154_v26 = vld [vmem:[#allocation5 + $0x30] sm:$0xff]   ;;  %v1158_v30 = vld [vmem:[#allocation5 + $0x38] sm:$0xff]   ;;  %v78_v33 = vld [vmem:[#allocation2 + $0x48] sm:$0xff] }
  0x41   :  { %1005 = vmatpush3.bf16.msra.mxu0 %v1138_v10  ;;  %v1155_v27 = vld [vmem:[#allocation5 + $0xb0] sm:$0xff]   ;;  %v1159_v31 = vld [vmem:[#allocation5 + $0xb8] sm:$0xff]   ;;  %v86_v35 = vpack.c.bf16 %v78_v33, %v70_v32  ;;  %v69_v37 = vld [vmem:[#allocation2] sm:$0xff] }
  0x42   :  { %1027 = vmatpush3.bf16.msra.mxu1 %v1139_v11  ;;  %1006 = vmatprep.subr.bf16.mxu0 %v1140_v12  ;;  %v72_v34 = vld [vmem:[#allocation2 + $0x18] sm:$0xff]  ;;  %v77_v38 = vld [vmem:[#allocation2 + $0x40] sm:$0xff]  ;;  %v71_v41 = vld [vmem:[#allocation2 + $0x10] sm:$0xff] }
  0x43   :  { %1028 = vmatprep.subr.bf16.mxu1 %v1141_v13  ;;  %v80_v36 = vld [vmem:[#allocation2 + $0x58] sm:$0xff]  ;;  %v85_v40 = vpack.c.bf16 %v77_v38, %v69_v37  ;;  %v79_v42 = vld [vmem:[#allocation2 + $0x50] sm:$0xff]  ;;  %639 = vmatprep.mubr.bf16.mxu0 %v86_v35  ;;  %v1160_v44 = vld [vmem:[#allocation5 + $0x140] sm:$0xff]  }
  0x44   :  { %v88_v39 = vpack.c.bf16 %v80_v36, %v72_v34  ;;  %v87_v43 = vpack.c.bf16 %v79_v42, %v71_v41  ;;  %v1161_v45 = vld [vmem:[#allocation5 + $0x1c0] sm:$0xff]   ;;  %v1164_v48 = vld [vmem:[#allocation5 + $0x148] sm:$0xff]   ;;  %v1168_v52 = vld [vmem:[#allocation5 + $0x150] sm:$0xff]  }
  0x45   :  { %1007 = vmatpush3.bf16.msra.mxu0 %v1142_v14  ;;  %v1162_v46 = vld [vmem:[#allocation5 + $0x100] sm:$0xff]   ;;  %v1165_v49 = vld [vmem:[#allocation5 + $0x1c8] sm:$0xff]   ;;  %v1169_v53 = vld [vmem:[#allocation5 + $0x1d0] sm:$0xff]  }
  0x46   :  { %1029 = vmatpush3.bf16.msra.mxu1 %v1143_v15  ;;  %1008 = vmatprep.subr.bf16.mxu0 %v1144_v16  ;;  %v1163_v47 = vld [vmem:[#allocation5 + $0x180] sm:$0xff]   ;;  %v1166_v50 = vld [vmem:[#allocation5 + $0x108] sm:$0xff]   ;;  %v1170_v54 = vld [vmem:[#allocation5 + $0x110] sm:$0xff]  }
  0x47   :  { %1030 = vmatprep.subr.bf16.mxu1 %v1145_v17  ;;  %680 = vmatprep.mubr.bf16.mxu1 %v88_v39  ;;  %v1167_v51 = vld [vmem:[#allocation5 + $0x188] sm:$0xff]   ;;  %v1171_v55 = vld [vmem:[#allocation5 + $0x190] sm:$0xff]   ;;  %v1172_v56 = vld [vmem:[#allocation5 + $0x158] sm:$0xff]  }
  0x48   :  { %v1173_v57 = vld [vmem:[#allocation5 + $0x1d8] sm:$0xff]   ;;  %v1176_v60 = vld [vmem:[#allocation5 + $0x160] sm:$0xff]   ;;  %v1180_v0 = vld [vmem:[#allocation5 + $0x168] sm:$0xff]  }
  0x49   :  { %1009 = vmatpush3.bf16.msra.mxu0 %v1146_v18  ;;  %v1174_v58 = vld [vmem:[#allocation5 + $0x118] sm:$0xff]   ;;  %v1177_v61 = vld [vmem:[#allocation5 + $0x1e0] sm:$0xff]   ;;  %v1181_v1 = vld [vmem:[#allocation5 + $0x1e8] sm:$0xff]  }
  0x4a   :  { %1031 = vmatpush3.bf16.msra.mxu1 %v1147_v19  ;;  %1010 = vmatprep.subr.bf16.mxu0 %v1148_v20  ;;  %v1175_v59 = vld [vmem:[#allocation5 + $0x198] sm:$0xff]   ;;  %v1178_v62 = vld [vmem:[#allocation5 + $0x120] sm:$0xff]   ;;  %v1182_v2 = vld [vmem:[#allocation5 + $0x128] sm:$0xff]  }
  0x4b   :  { %1032 = vmatprep.subr.bf16.mxu1 %v1149_v21  ;;  %v1179_v63 = vld [vmem:[#allocation5 + $0x1a0] sm:$0xff]   ;;  %v1183_v3 = vld [vmem:[#allocation5 + $0x1a8] sm:$0xff]   ;;  %v1184_v4 = vld [vmem:[#allocation5 + $0x170] sm:$0xff]  }
  0x4c   :  { %v1185_v5 = vld [vmem:[#allocation5 + $0x1f0] sm:$0xff]   ;;  %v1188_v8 = vld [vmem:[#allocation5 + $0x178] sm:$0xff]   ;;  %v74_v12 = vld [vmem:[#allocation2 + $0x28] sm:$0xff] }
  0x4d   :  { %1011 = vmatpush3.bf16.msra.mxu0 %v1150_v22  ;;  %v1186_v6 = vld [vmem:[#allocation5 + $0x130] sm:$0xff]   ;;  %v1189_v9 = vld [vmem:[#allocation5 + $0x1f8] sm:$0xff]   ;;  %v82_v13 = vld [vmem:[#allocation2 + $0x68] sm:$0xff] }
  0x4e   :  { %1033 = vmatpush3.bf16.msra.mxu1 %v1151_v23  ;;  %1012 = vmatprep.subr.bf16.mxu0 %v1152_v24  ;;  %v1187_v7 = vld [vmem:[#allocation5 + $0x1b0] sm:$0xff]   ;;  %v1190_v10 = vld [vmem:[#allocation5 + $0x138] sm:$0xff]   ;;  %v90_v16 = vpack.c.bf16 %v82_v13, %v74_v12  ;;  %v73_v18 = vld [vmem:[#allocation2 + $0x20] sm:$0xff] }
  0x4f   :  { %1034 = vmatprep.subr.bf16.mxu1 %v1153_v25  ;;  %v1191_v11 = vld [vmem:[#allocation5 + $0x1b8] sm:$0xff]   ;;  %v81_v19 = vld [vmem:[#allocation2 + $0x60] sm:$0xff]  ;;  %v75_v20 = vld [vmem:[#allocation2 + $0x30] sm:$0xff]  ;;  %v1300_v25 = vmov 0.0  }
  0x50   :  { %v76_v14 = vld [vmem:[#allocation2 + $0x38] sm:$0xff]  ;;  %v89_v21 = vpack.c.bf16 %v81_v19, %v73_v18  ;;  %v83_v22 = vld [vmem:[#allocation2 + $0x70] sm:$0xff]  ;;  %v1192_v24 = vld [vmem:[#allocation7] sm:$0xff]  }
  0x51   :  { %1013 = vmatpush3.bf16.msra.mxu0 %v1154_v26  ;;  %v84_v15 = vld [vmem:[#allocation2 + $0x78] sm:$0xff]  ;;  %v91_v23 = vpack.c.bf16 %v83_v22, %v75_v20  ;;  %v1193_v26 = vld [vmem:[#allocation7 + $0x8] sm:$0xff]  }
  0x52   :  { %1035 = vmatpush3.bf16.msra.mxu1 %v1155_v27  ;;  %1014 = vmatprep.subr.bf16.mxu0 %v1156_v28  ;;  %v92_v17 = vpack.c.bf16 %v84_v15, %v76_v14  ;;  %v1194_v27 = vld [vmem:[#allocation7 + $0x10] sm:$0xff]   ;;  %v1195_v28 = vld [vmem:[#allocation7 + $0x18] sm:$0xff]  }
  0x53   :  { %1036 = vmatprep.subr.bf16.mxu1 %v1157_v29  ;;  %v1196_v29 = vld [vmem:[#allocation7 + $0x20] sm:$0xff]   ;;  %v1199_v32 = vld [vmem:[#allocation7 + $0x38] sm:$0xff]  }
  0x55   :  { %1015 = vmatpush3.bf16.msra.mxu0 %v1158_v30  ;;  %v1197_v30 = vld [vmem:[#allocation7 + $0x28] sm:$0xff]  }
  0x56   :  { %1037 = vmatpush3.bf16.msra.mxu1 %v1159_v31  ;;  %1044 = vmatprep.subr.bf16.mxu0 %v1160_v44  ;;  %v1198_v31 = vld [vmem:[#allocation7 + $0x30] sm:$0xff]  }
  0x57   :  { %1066 = vmatprep.subr.bf16.mxu1 %v1161_v45 }
  0x58   :  { %640 = vmatmul.mubr.bf16.vlgmr.msra.gmra.mrb[0].mxu0 %v85_v40 }
  0x59   :  { %681 = vmatmul.mubr.bf16.vlgmr.msra.gmra.mrb[0].mxu1 %v87_v43  ;;  %1045 = vmatpush3.bf16.msra.mxu0 %v1162_v46 }
  0x5a   :  { %1067 = vmatpush3.bf16.msra.mxu1 %v1163_v47  ;;  %1046 = vmatprep.subr.bf16.mxu0 %v1164_v48 }
  0x5b   :  { %1068 = vmatprep.subr.bf16.mxu1 %v1165_v49  ;;  %721 = vmatprep.mubr.bf16.mxu0 %v90_v16 }
  0x5c   :  { %762 = vmatprep.mubr.bf16.mxu1 %v92_v17 }
  0x5d   :  { %1047 = vmatpush3.bf16.msra.mxu0 %v1166_v50 }
  0x5e   :  { %1069 = vmatpush3.bf16.msra.mxu1 %v1167_v51  ;;  %1048 = vmatprep.subr.bf16.mxu0 %v1168_v52 }
  0x5f   :  { %1070 = vmatprep.subr.bf16.mxu1 %v1169_v53 }
  0x61   :  { %1049 = vmatpush3.bf16.msra.mxu0 %v1170_v54 }
  0x62   :  { %1071 = vmatpush3.bf16.msra.mxu1 %v1171_v55  ;;  %1050 = vmatprep.subr.bf16.mxu0 %v1172_v56 }
  0x63   :  { %1072 = vmatprep.subr.bf16.mxu1 %v1173_v57 }
  0x65   :  { %1051 = vmatpush3.bf16.msra.mxu0 %v1174_v58 }
  0x66   :  { %1073 = vmatpush3.bf16.msra.mxu1 %v1175_v59  ;;  %1052 = vmatprep.subr.bf16.mxu0 %v1176_v60 }
  0x67   :  { %1074 = vmatprep.subr.bf16.mxu1 %v1177_v61 }
  0x69   :  { %1053 = vmatpush3.bf16.msra.mxu0 %v1178_v62  ;;  %v990_v62 = vld [vmem:[%s1398_s2] ss:$0 sm:$0xff]  ;;  %s1266_s2 = scalar_lea.vmem %s914_s9, 256 }
  0x6a   :  { %1075 = vmatpush3.bf16.msra.mxu1 %v1179_v63  ;;  %1054 = vmatprep.subr.bf16.mxu0 %v1180_v0  ;;  %p1267_p10 = scmp.ne.s32.totalorder %s914_s9, %s1266_s2  ;;  %p1272_p12 = scmp.lt.s32.totalorder %s1266_s2, %s1266_s2 }
  0x6b   :  { %1076 = vmatprep.subr.bf16.mxu1 %v1181_v1 }
  0x6c   :  { %p1273_p13 = por %p1272_p12, %p1271_p11 }
  0x6d   :  { %1055 = vmatpush3.bf16.msra.mxu0 %v1182_v2 }
  0x6e   :  { %1077 = vmatpush3.bf16.msra.mxu1 %v1183_v3  ;;  %1056 = vmatprep.subr.bf16.mxu0 %v1184_v4  ;;  %p1274_p0 = pnand %p1273_p13, %p1267_p10 }
  0x6f   :  { %1078 = vmatprep.subr.bf16.mxu1 %v1185_v5  ;;  %v991_v5 = vld [vmem:[%s1400_s4] ss:$0 sm:$0xff] }
  0x71   :  { %1057 = vmatpush3.bf16.msra.mxu0 %v1186_v6 }
  0x72   :  { %1079 = vmatpush3.bf16.msra.mxu1 %v1187_v7  ;;  %1058 = vmatprep.subr.bf16.mxu0 %v1188_v8 }
  0x73   :  { %1080 = vmatprep.subr.bf16.mxu1 %v1189_v9 }
  0x75   :  { %1059 = vmatpush3.bf16.msra.mxu0 %v1190_v10 }
  0x76   :  { %1081 = vmatpush3.bf16.msra.mxu1 %v1191_v11  ;;  %1097 = vmatprep.subr.bf16.mxu0 %v1300_v25 }
  0x78   :  { %722 = vmatmul.mubr.bf16.vlgmr.msra.gmra.mrb[4].mxu0 %v89_v21 }
  0x79   :  { %763 = vmatmul.mubr.bf16.vlgmr.msra.gmra.mrb[4].mxu1 %v91_v23  ;;  %1098 = vmatpush3.bf16.msra.mxu0 %v1192_v24 }
  0x7a   :  { %1099 = vmatprep.subr.bf16.mxu0 %v1300_v25  ;;  %1113 = vmatprep.mubr.msk.bf16.mxu0 %vm1301_vm0, %v1300_v25 }
  0x7d   :  { %1100 = vmatpush3.bf16.msra.mxu0 %v1193_v26 }
  0x7e   :  { %1101 = vmatprep.subr.bf16.mxu0 %v1300_v25 }
  0x81   :  { %1102 = vmatpush3.bf16.msra.mxu0 %v1194_v27 }
  0x82   :  { %1103 = vmatprep.subr.bf16.mxu0 %v1300_v25 }
  0x85   :  { %1104 = vmatpush3.bf16.msra.mxu0 %v1195_v28 }
  0x86   :  { %1105 = vmatprep.subr.bf16.mxu0 %v1300_v25 }
  0x89   :  { %1106 = vmatpush3.bf16.msra.mxu0 %v1196_v29 }
  0x8a   :  { %1107 = vmatprep.subr.bf16.mxu0 %v1300_v25 }
  0x8d   :  { %1108 = vmatpush3.bf16.msra.mxu0 %v1197_v30 }
  0x8e   :  { %1109 = vmatprep.subr.bf16.mxu0 %v1300_v25 }
  0x91   :  { %1110 = vmatpush3.bf16.msra.mxu0 %v1198_v31 }
  0x92   :  { %1111 = vmatprep.subr.bf16.mxu0 %v1300_v25 }
  0x95   :  { %1112 = vmatpush3.bf16.msra.mxu0 %v1199_v32 }
 0x12b   :  { %v1016_v33 = vpop.f32.mrb[0].mxu0 }
 0x12c   :  { %v1038_v34 = vpop.f32.mrb[0].mxu1  ;;  %v1017_v35 = vpop.f32.mrb[1].mxu0 }
 0x12d   :  { %v1018_v36 = vadd.f32 %v1017_v35, %v1016_v33  ;;  %v1039_v37 = vpop.f32.mrb[1].mxu1  ;;  %v1019_v38 = vpop.f32.mrb[2].mxu0 }
 0x12e   :  { %v1040_v39 = vadd.f32 %v1039_v37, %v1038_v34  ;;  %v1041_v40 = vpop.f32.mrb[2].mxu1  ;;  %v1020_v41 = vpop.f32.mrb[3].mxu0 }
 0x12f   :  { %v1021_v42 = vadd.f32 %v1020_v41, %v1019_v38  ;;  %v1042_v43 = vpop.f32.mrb[3].mxu1 }
 0x130   :  { %v683_v44 = vadd.f32 %v1040_v39, %v1018_v36  ;;  %v1043_v45 = vadd.f32 %v1042_v43, %v1041_v40 }
 0x132   :  { %v686_v46 = vadd.f32 %v1043_v45, %v1021_v42 }
 0x14b   :  { %v1060_v47 = vpop.f32.mrb[4].mxu0 }
 0x14c   :  { %v1082_v48 = vpop.f32.mrb[4].mxu1  ;;  %v1061_v49 = vpop.f32.mrb[5].mxu0 }
 0x14d   :  { %v1062_v50 = vadd.f32 %v1061_v49, %v1060_v47  ;;  %v1083_v51 = vpop.f32.mrb[5].mxu1  ;;  %v1063_v52 = vpop.f32.mrb[6].mxu0 }
 0x14e   :  { %v1084_v53 = vadd.f32 %v1083_v51, %v1082_v48  ;;  %v1085_v54 = vpop.f32.mrb[6].mxu1  ;;  %v1064_v55 = vpop.f32.mrb[7].mxu0 }
 0x14f   :  { %v724_v56 = vadd.f32 %v1062_v50, %v683_v44  ;;  %v1065_v57 = vadd.f32 %v1064_v55, %v1063_v52  ;;  %v1086_v58 = vpop.f32.mrb[7].mxu1 }
 0x150   :  { %v1087_v59 = vadd.f32 %v1086_v58, %v1085_v54 }
 0x151   :  { %v765_v60 = vadd.f32 %v1084_v53, %v724_v56  ;;  %v727_v61 = vadd.f32 %v1065_v57, %v686_v46 }
 0x153   :  { %v768_v63 = vadd.f32 %v1087_v59, %v727_v61  ;;  %v787_v0 = vadd.f32 %v990_v62, %v765_v60 }
 0x155   :  { %v788_v1 = vadd.f32 %v990_v62, %v768_v63  ;;  %v789_v2 = vmax.f32 %v787_v0, 0.0 }
 0x157   :  { %v790_v3 = vmax.f32 %v788_v1, 0.0 }
 0x159   :  { %v791_v4 = vpack.c.bf16 %v790_v3, %v789_v2 }
 0x15b   :  { %1114 = vmatmul.mubr.bf16.vlgmr.msra.gmra.mrb[8].mxu0 %v791_v4 }
 0x22e   :  { %v897_v6 = vpop.f32.mrb[8].mxu0 }
 0x22f   :  { %v898_v7 = vadd.f32 %v991_v5, %v897_v6  ;;  %v1115_v8 = vpop.f32.mrb[9].mxu0 }
 0x230   :  { %v900_v9 = vpop.f32.mrb[10].mxu0 }
 0x231   :  { %v904_v10 = vmax.f32 %v898_v7, 0.0  ;;  %v901_v11 = vadd.f32 %v991_v5, %v900_v9  ;;  %v1116_v12 = vpop.f32.mrb[11].mxu0 }
 0x233   :  { %906 = vst [vmem:[#allocation8] sm:$0xff] %v904_v10  ;;  %v905_v13 = vmax.f32 %v901_v11, 0.0 }
 0x235   :  { %907 = vst [vmem:[#allocation8 + $0x8] sm:$0xff] %v905_v13 }
 0x236   :  { %1277 = shalt.err (!%p1274_p0)
}
 0x237   :  { %s1278_s11 = scalar_lea.hbm %s1401_s5, 256 }
 0x238   :  { %p1279_p1 = scmp.ne.s32.totalorder %s1401_s5, %s1278_s11  ;;  %p1282_p2 = scmp.lt.u32.totalorder %s1278_s11, %s1401_s5 }
 0x23a   :  { %p1284_p3 = pnand %p1282_p2, %p1279_p1 }
 0x23c   :  { %1287 = shalt.err (!%p1284_p3)
}
 0x23d   :  { %s1303_s16 = smov 128   ;;  %s1304_s1 = smov 8  }
 0x23e   :  { %919 = dma.vmem_to_hbm [thread:$0]  %s914_s9, 256, %s1401_s5, [#allocation4], %s1303_s16, %s1303_s16, %s1304_s1  }
 0x23f   :  { %1292 = dma.done.wait [#allocation4], 256  }
 0x240   :  { %1293 = vsyncadd [#allocation4], 4294967040 }
 0x241   :  { %923 = vsyncpa [#allocation3], 1 }
 0x242   :  { %924 = vsyncpa [#allocation6], 1 }
 0x243   :  { %925 = vsyncpa [#allocation4], 1 }

</bundles_post_ra>
